<compile_context>
chip_gen: v6e
topology: v6e:2x2x1
jax: 0.10.0
libtpu: 0.0.40
codegen_flags: <defaults>
</compile_context>

<pallas_src>
import math
import functools

import jax
import jax.numpy as jnp
from jax.experimental import pallas as pl
from jax.experimental.pallas import tpu as pltpu

VOCAB_OUT = 768  # hard-coded decoder output dim in the PyTorch module
_SQRT_2 = math.sqrt(2.0)
_SQRT_2_OVER_PI = math.sqrt(2.0 / math.pi)


def _gelu_exact(x):
    # x * 0.5 * (1 + erf(x / sqrt(2)))   -- matches torch erf GELU
    return x * 0.5 * (1.0 + jax.lax.erf(x / _SQRT_2))


def _gelu_tanh(x):
    # OpenAI-GPT tanh approximation; routes to the EUP (optional, off by default).
    return 0.5 * x * (1.0 + jnp.tanh(_SQRT_2_OVER_PI * (x + 0.044715 * x * x * x)))


def mlm_head_kernel(x_ref, w1_ref, b1_ref, gamma_ref, beta_ref,
                    w2_ref, b2_ref, o_ref, *, eps, approx_gelu, mm_dtype):
    # dense (H -> H): bf16 MXU inputs, f32 accumulation
    h = jnp.dot(x_ref[...], w1_ref[...],
                preferred_element_type=jnp.float32) + b1_ref[...]

    # GELU (exact erf by default = module semantics)
    h = _gelu_tanh(h) if approx_gelu else _gelu_exact(h)

    # LayerNorm over last dim, single-pass statistics, f32
    inv_h = 1.0 / h.shape[-1]
    s1 = jnp.sum(h, axis=-1, keepdims=True)
    s2 = jnp.sum(h * h, axis=-1, keepdims=True)
    mean = s1 * inv_h
    var = jnp.maximum(s2 * inv_h - mean * mean, 0.0)
    h = (h - mean) * jax.lax.rsqrt(var + eps)
    h = h * gamma_ref[...] + beta_ref[...]

    # decoder (H -> 768): cast LN output to bf16 for the MXU, f32 accum + bias
    out = jnp.dot(h.astype(mm_dtype), w2_ref[...],
                  preferred_element_type=jnp.float32) + b2_ref[...]
    o_ref[...] = out.astype(o_ref.dtype)


def visual_only_mlm_head(x, params, *, eps=1e-12, tm=None,
                         approx_gelu=False, matmul_dtype=jnp.bfloat16):
    """x: [B, S, H] float32.  Returns [B, S, 768]."""
    B, S, H = x.shape
    V = params["w2"].shape[1]
    M = B * S

    # Row tile: multiple of 8 (sublane).  256 on realistic shapes (MXU-aligned
    # on v6e/v7x, fine on v5e); for tiny inputs shrink so the parallel grid
    # axis still has >= 2 steps (megacore on v7x).
    if tm is None:
        tm = 256
        if M < 2 * tm:
            tm = max(8, 8 * pl.cdiv(pl.cdiv(M, 2), 8))
    tm = max(8, 8 * pl.cdiv(tm, 8))

    n_tiles = pl.cdiv(M, tm)
    M_pad = n_tiles * tm

    # Cast GEMM operands to bf16 (halves HBM traffic too); keep bias/LN in f32.
    x2 = x.reshape(M, H).astype(matmul_dtype)
    if M_pad != M:
        x2 = jnp.pad(x2, ((0, M_pad - M), (0, 0)))  # pad rows; sliced off below
    w1 = params["w1"].astype(matmul_dtype)
    w2 = params["w2"].astype(matmul_dtype)
    b1 = params["b1"].astype(jnp.float32)
    gamma = params["gamma"].astype(jnp.float32)
    beta = params["beta"].astype(jnp.float32)
    b2 = params["b2"].astype(jnp.float32)

    mm_bytes = jnp.dtype(matmul_dtype).itemsize
    out_bytes = jnp.dtype(x.dtype).itemsize

    # VMEM budget: single-buffered weights + double-buffered x/out tiles +
    # f32 intermediates, with headroom; capped below v7x's 64 MiB physical.
    est = ((H * H + H * V) * mm_bytes + 4 * (H + V) * 4
           + 2 * tm * H * mm_bytes + 2 * tm * V * out_bytes
           + tm * (H + V) * 4)
    vmem_limit = min(max(int(est * 3 // 2) + (4 << 20), 32 << 20), 64 << 20)

    cost = pl.CostEstimate(
        flops=2 * M_pad * H * (H + V),
        transcendentals=M_pad * H,
        bytes_accessed=(M_pad * H * mm_bytes
                        + (H * H + H * V) * mm_bytes
                        + (3 * H + 2 * V) * 4
                        + M_pad * V * out_bytes),
    )

    const = pl.Buffered(1)  # grid-invariant operands: single-buffer in VMEM

    out = pl.pallas_call(
        functools.partial(mlm_head_kernel, eps=eps, approx_gelu=approx_gelu,
                          mm_dtype=matmul_dtype),
        out_shape=jax.ShapeDtypeStruct((M_pad, V), x.dtype),
        grid_spec=pltpu.PrefetchScalarGridSpec(
            num_scalar_prefetch=0,
            grid=(n_tiles,),
            in_specs=[
                pl.BlockSpec((tm, H), lambda i: (i, 0)),                          # x rows
                pl.BlockSpec((H, H), lambda i: (0, 0), pipeline_mode=const),      # dense W^T
                pl.BlockSpec((1, H), lambda i: (0, 0), pipeline_mode=const),      # dense bias
                pl.BlockSpec((1, H), lambda i: (0, 0), pipeline_mode=const),      # LN gamma
                pl.BlockSpec((1, H), lambda i: (0, 0), pipeline_mode=const),      # LN beta
                pl.BlockSpec((H, V), lambda i: (0, 0), pipeline_mode=const),      # decoder W^T
                pl.BlockSpec((1, V), lambda i: (0, 0), pipeline_mode=const),      # decoder bias
            ],
            out_specs=pl.BlockSpec((tm, V), lambda i: (i, 0)),
        ),
        compiler_params=pltpu.CompilerParams(
            dimension_semantics=("parallel",),
            vmem_limit_bytes=vmem_limit,
        ),
        cost_estimate=cost,
    )(x2, w1, b1, gamma, beta, w2, b2)

    if M_pad != M:
        out = out[:M]
    return out.reshape(B, S, V)


def init_params(key, hidden_size):
    """Deterministic synthetic init mirroring the module's parameter shapes."""
    k1, k2, k3 = jax.random.split(key, 3)
    w1 = jax.random.normal(k1, (hidden_size, hidden_size), jnp.float32) * 0.02
    b1 = jax.random.normal(k2, (1, hidden_size), jnp.float32) * 0.02
    gamma = jnp.ones((1, hidden_size), jnp.float32)
    beta = jnp.zeros((1, hidden_size), jnp.float32)
    w2 = jax.random.normal(k3, (hidden_size, VOCAB_OUT), jnp.float32) * 0.02
    b2 = jnp.zeros((1, VOCAB_OUT), jnp.float32)  # nn.Parameter(torch.zeros(768))
    return {"w1": w1, "b1": b1, "gamma": gamma, "beta": beta, "w2": w2, "b2": b2}


def reference(x, params, eps=1e-12):
    h = x @ params["w1"] + params["b1"][0]
    h = _gelu_exact(h)
    mean = jnp.mean(h, axis=-1, keepdims=True)
    var = jnp.mean((h - mean) ** 2, axis=-1, keepdims=True)
    h = (h - mean) / jnp.sqrt(var + eps)
    h = h * params["gamma"][0] + params["beta"][0]
    return h @ params["w2"] + params["b2"][0]


if __name__ == "__main__":
    B, S, H = 2, 8, 32
    key = jax.random.PRNGKey(0)
    kx, kp = jax.random.split(key)
    x = jax.random.normal(kx, (B, S, H), jnp.float32)
    params = init_params(kp, H)

    # main path: auto tile selection (2 grid steps at this tiny M)
    out = jax.block_until_ready(visual_only_mlm_head(x, params))
    ref = reference(x, params)
    assert out.shape == (B, S, VOCAB_OUT), out.shape
    err = float(jnp.max(jnp.abs(out - ref)))
    # bf16 GEMM inputs with f32 accumulation -> loosened tolerance vs pure f32.
    assert err < 2e-2, err

    # remainder-row path: M=10 with tm=8 -> padded to 16 rows, tail sliced off
    x_tail = x[:, :5, :]
    out_tail = jax.block_until_ready(visual_only_mlm_head(x_tail, params, tm=8))
    ref_tail = reference(x_tail, params)
    assert out_tail.shape == (B, 5, VOCAB_OUT), out_tail.shape
    err_tail = float(jnp.max(jnp.abs(out_tail - ref_tail)))
    assert err_tail < 2e-2, err_tail

    print("KERNEL_OK")
</pallas_src>

<mosaic_0001>
module attributes {stable_mosaic.version = 11 : i64} {
  func.func @mlm_head_kernel(%arg0: i32, %arg1: memref<8x32xbf16, #tpu.memory_space<vmem>>, %arg2: memref<32x32xbf16, #tpu.memory_space<vmem>>, %arg3: memref<1x32xf32, #tpu.memory_space<vmem>>, %arg4: memref<1x32xf32, #tpu.memory_space<vmem>>, %arg5: memref<1x32xf32, #tpu.memory_space<vmem>>, %arg6: memref<32x768xbf16, #tpu.memory_space<vmem>>, %arg7: memref<1x768xf32, #tpu.memory_space<vmem>>, %arg8: memref<8x768xf32, #tpu.memory_space<vmem>>) attributes {dimension_semantics = [#tpu.dimension_semantics<parallel>], iteration_bounds = array<i64: 2>, scalar_prefetch = 0 : i64, scratch_operands = 0 : i64, tpu.core_type = #tpu.core_type<tc>, window_params = [{transform_indices = @transform_0, window_bounds = array<i64: 8, 32>}, {pipeline_mode = #tpu.pipeline_mode<synchronous>, transform_indices = @transform_1, window_bounds = array<i64: 32, 32>}, {pipeline_mode = #tpu.pipeline_mode<synchronous>, transform_indices = @transform_2, window_bounds = array<i64: 1, 32>}, {pipeline_mode = #tpu.pipeline_mode<synchronous>, transform_indices = @transform_3, window_bounds = array<i64: 1, 32>}, {pipeline_mode = #tpu.pipeline_mode<synchronous>, transform_indices = @transform_4, window_bounds = array<i64: 1, 32>}, {pipeline_mode = #tpu.pipeline_mode<synchronous>, transform_indices = @transform_5, window_bounds = array<i64: 32, 768>}, {pipeline_mode = #tpu.pipeline_mode<synchronous>, transform_indices = @transform_6, window_bounds = array<i64: 1, 768>}, {transform_indices = @transform_7, window_bounds = array<i64: 8, 768>}]} {
    %c0 = arith.constant 0 : index
    %c0_0 = arith.constant 0 : index
    %0 = vector.load %arg1[%c0, %c0_0] : memref<8x32xbf16, #tpu.memory_space<vmem>>, vector<8x32xbf16>
    %c0_1 = arith.constant 0 : index
    %c0_2 = arith.constant 0 : index
    %1 = vector.load %arg2[%c0_1, %c0_2] : memref<32x32xbf16, #tpu.memory_space<vmem>>, vector<32x32xbf16>
    %cst = arith.constant dense<0.000000e+00> : vector<8x32xf32>
    %2 = tpu.matmul %0, %1, %cst {dimension_numbers = #tpu.dot_dimension_numbers<[1], [0], [0], [1], [0, 0, 1, 1], [], []>} : vector<8x32xbf16>, vector<32x32xbf16>, vector<8x32xf32> -> vector<8x32xf32>
    %c0_3 = arith.constant 0 : index
    %c0_4 = arith.constant 0 : index
    %3 = vector.load %arg3[%c0_3, %c0_4] : memref<1x32xf32, #tpu.memory_space<vmem>>, vector<1x32xf32>
    %4 = vector.broadcast %3 : vector<1x32xf32> to vector<8x32xf32>
    %5 = arith.addf %2, %4 : vector<8x32xf32>
    %cst_5 = arith.constant 5.000000e-01 : f32
    %6 = vector.broadcast %cst_5 : f32 to vector<8x32xf32>
    %7 = arith.mulf %5, %6 : vector<8x32xf32>
    %cst_6 = arith.constant 1.41421354 : f32
    %8 = vector.broadcast %cst_6 : f32 to vector<8x32xf32>
    %9 = arith.divf %5, %8 : vector<8x32xf32>
    %10 = math.erf %9 : vector<8x32xf32>
    %cst_7 = arith.constant 1.000000e+00 : f32
    %11 = vector.broadcast %cst_7 : f32 to vector<8x32xf32>
    %12 = arith.addf %11, %10 : vector<8x32xf32>
    %13 = arith.mulf %7, %12 : vector<8x32xf32>
    %cst_8 = arith.constant dense<0.000000e+00> : vector<8xf32>
    %14 = vector.multi_reduction <add>, %13, %cst_8 [1] : vector<8x32xf32> to vector<8xf32>
    %15 = vector.shape_cast %14 : vector<8xf32> to vector<8x1xf32>
    %16 = arith.mulf %13, %13 : vector<8x32xf32>
    %cst_9 = arith.constant dense<0.000000e+00> : vector<8xf32>
    %17 = vector.multi_reduction <add>, %16, %cst_9 [1] : vector<8x32xf32> to vector<8xf32>
    %18 = vector.shape_cast %17 : vector<8xf32> to vector<8x1xf32>
    %cst_10 = arith.constant 3.125000e-02 : f32
    %19 = vector.broadcast %cst_10 : f32 to vector<8x1xf32>
    %20 = arith.mulf %15, %19 : vector<8x1xf32>
    %cst_11 = arith.constant 3.125000e-02 : f32
    %21 = vector.broadcast %cst_11 : f32 to vector<8x1xf32>
    %22 = arith.mulf %18, %21 : vector<8x1xf32>
    %23 = arith.mulf %20, %20 : vector<8x1xf32>
    %24 = arith.subf %22, %23 : vector<8x1xf32>
    %cst_12 = arith.constant 0.000000e+00 : f32
    %25 = vector.broadcast %cst_12 : f32 to vector<8x1xf32>
    %26 = arith.maximumf %24, %25 : vector<8x1xf32>
    %27 = vector.broadcast %20 : vector<8x1xf32> to vector<8x32xf32>
    %28 = arith.subf %13, %27 : vector<8x32xf32>
    %cst_13 = arith.constant 9.99999996E-13 : f32
    %29 = vector.broadcast %cst_13 : f32 to vector<8x1xf32>
    %30 = arith.addf %26, %29 : vector<8x1xf32>
    %31 = math.rsqrt %30 : vector<8x1xf32>
    %32 = vector.broadcast %31 : vector<8x1xf32> to vector<8x32xf32>
    %33 = arith.mulf %28, %32 : vector<8x32xf32>
    %c0_14 = arith.constant 0 : index
    %c0_15 = arith.constant 0 : index
    %34 = vector.load %arg4[%c0_14, %c0_15] : memref<1x32xf32, #tpu.memory_space<vmem>>, vector<1x32xf32>
    %35 = vector.broadcast %34 : vector<1x32xf32> to vector<8x32xf32>
    %36 = arith.mulf %33, %35 : vector<8x32xf32>
    %c0_16 = arith.constant 0 : index
    %c0_17 = arith.constant 0 : index
    %37 = vector.load %arg5[%c0_16, %c0_17] : memref<1x32xf32, #tpu.memory_space<vmem>>, vector<1x32xf32>
    %38 = vector.broadcast %37 : vector<1x32xf32> to vector<8x32xf32>
    %39 = arith.addf %36, %38 : vector<8x32xf32>
    %40 = arith.truncf %39 : vector<8x32xf32> to vector<8x32xbf16>
    %c0_18 = arith.constant 0 : index
    %c0_19 = arith.constant 0 : index
    %41 = vector.load %arg6[%c0_18, %c0_19] : memref<32x768xbf16, #tpu.memory_space<vmem>>, vector<32x768xbf16>
    %cst_20 = arith.constant dense<0.000000e+00> : vector<8x768xf32>
    %42 = tpu.matmul %40, %41, %cst_20 {dimension_numbers = #tpu.dot_dimension_numbers<[1], [0], [0], [1], [0, 0, 1, 1], [], []>} : vector<8x32xbf16>, vector<32x768xbf16>, vector<8x768xf32> -> vector<8x768xf32>
    %c0_21 = arith.constant 0 : index
    %c0_22 = arith.constant 0 : index
    %43 = vector.load %arg7[%c0_21, %c0_22] : memref<1x768xf32, #tpu.memory_space<vmem>>, vector<1x768xf32>
    %44 = vector.broadcast %43 : vector<1x768xf32> to vector<8x768xf32>
    %45 = arith.addf %42, %44 : vector<8x768xf32>
    %c0_23 = arith.constant 0 : index
    %c0_24 = arith.constant 0 : index
    %46 = vector.load %arg8[%c0_23, %c0_24] : memref<8x768xf32, #tpu.memory_space<vmem>>, vector<8x768xf32>
    tpu.vector_store %arg8[%c0_23, %c0_24], %45 {strides = array<i32>} : memref<8x768xf32, #tpu.memory_space<vmem>>, vector<8x768xf32>,
    return
  }
  func.func @transform_0(%arg0: i32) -> (i32, i32) {
    %c0_i32 = arith.constant 0 : i32
    %c0_i32_0 = arith.constant 0 : i32
    return %arg0, %c0_i32 : i32, i32
  }
  func.func @transform_1(%arg0: i32) -> (i32, i32) {
    %c0_i32 = arith.constant 0 : i32
    %c0_i32_0 = arith.constant 0 : i32
    %c0_i32_1 = arith.constant 0 : i32
    return %c0_i32, %c0_i32_0 : i32, i32
  }
  func.func @transform_2(%arg0: i32) -> (i32, i32) {
    %c0_i32 = arith.constant 0 : i32
    %c0_i32_0 = arith.constant 0 : i32
    %c0_i32_1 = arith.constant 0 : i32
    return %c0_i32, %c0_i32_0 : i32, i32
  }
  func.func @transform_3(%arg0: i32) -> (i32, i32) {
    %c0_i32 = arith.constant 0 : i32
    %c0_i32_0 = arith.constant 0 : i32
    %c0_i32_1 = arith.constant 0 : i32
    return %c0_i32, %c0_i32_0 : i32, i32
  }
  func.func @transform_4(%arg0: i32) -> (i32, i32) {
    %c0_i32 = arith.constant 0 : i32
    %c0_i32_0 = arith.constant 0 : i32
    %c0_i32_1 = arith.constant 0 : i32
    return %c0_i32, %c0_i32_0 : i32, i32
  }
  func.func @transform_5(%arg0: i32) -> (i32, i32) {
    %c0_i32 = arith.constant 0 : i32
    %c0_i32_0 = arith.constant 0 : i32
    %c0_i32_1 = arith.constant 0 : i32
    return %c0_i32, %c0_i32_0 : i32, i32
  }
  func.func @transform_6(%arg0: i32) -> (i32, i32) {
    %c0_i32 = arith.constant 0 : i32
    %c0_i32_0 = arith.constant 0 : i32
    %c0_i32_1 = arith.constant 0 : i32
    return %c0_i32, %c0_i32_0 : i32, i32
  }
  func.func @transform_7(%arg0: i32) -> (i32, i32) {
    %c0_i32 = arith.constant 0 : i32
    %c0_i32_0 = arith.constant 0 : i32
    return %arg0, %c0_i32 : i32, i32
  }
}

</mosaic_0001>

<bundles_post_ra>
// kernel: tpu_custom_call.1
= control target key start
LH: loop header
LB: loop body
LE: loop exit
PB: predicated region body
PF: predicated region fallthrough
CT: control target
= control target key end

     0   :  { %s1314_s0 = inlined_call_operand.hbm [shape: bf16[16,32], index: 0, kind: input, shape index: {}]   ;;  %s1315_s1 = inlined_call_operand.hbm [shape: bf16[32,32], index: 1, kind: input, shape index: {}]   ;;  %s1316_s2 = inlined_call_operand.vmem [shape: f32[1,32], index: 2, kind: input, shape index: {}]   ;;  %s1317_s3 = inlined_call_operand.vmem [shape: f32[1,32], index: 3, kind: input, shape index: {}]   ;;  %s1318_s4 = inlined_call_operand.vmem [shape: f32[1,32], index: 4, kind: input, shape index: {}]   ;;  %s1319_s5 = inlined_call_operand.hbm [shape: bf16[32,768], index: 5, kind: input, shape index: {}]   ;;  %s1320_s6 = inlined_call_operand.vmem [shape: f32[1,768], index: 6, kind: input, shape index: {}]   ;;  %s1321_s7 = inlined_call_operand.hbm [shape: f32[16,768], index: 7, kind: output, shape index: {}]  }
   0x1   :  { %1326 = sst [smem:[#allocation12_spill]] %s1315_s1 }
   0x2   :  { %1327 = sst [smem:[#allocation13_spill]] %s1319_s5 }
   0x3   :  { %12 = vsyncpa [#allocation3], 0 }
   0x4   :  { %14 = vsyncpa [#allocation3 + $0x1], 0 }
   0x5   :  { %15 = vsyncpa [#allocation6], 0 }
   0x6   :  { %16 = vsyncpa [#allocation4], 0 }
   0x7   :  { %18 = vsyncpa [#allocation4 + $0x1], 0  ;;  %s1118_s24 = smov 0   ;;  %s1120_s25 = smov 0  }
   0x8   :  { %s1122_s26 = smov 0   ;;  %s1124_s27 = smov 0  }
   0x9 LB: > { %s1139_s28 = sadd.s32 4294967295, %s1065_s27   ;;  %s771_s29 = sadd.s32 4294967294, %s1065_s27   ;;  %s1065_s27 = sphi %s1124_s27, %s1347_s27   ;;  %s1061_s26 = sphi %s1122_s26, %s1346_s26   ;;  %s1057_s25 = sphi %s1120_s25, %s1345_s25   ;;  %s1053_s24 = sphi %s1118_s24, %s1344_s24  }
   0xa   : > { %p44_p0 = scmp.ne.s32.totalorder %s1057_s25, %s1053_s24  ;;  %p1322_p1 = scmp.eq.s32.totalorder %s1139_s28, 0 }
   0xb   : > { %p200_p3 = scmp.eq.s32.totalorder %s771_s29, 1  ;;  %p772_p5 = scmp.ge.s32.totalorder %s1065_s27, 1 }
   0xc   : > { %p1148_p4 = por %p1322_p1, %p44_p0  ;;  %p207_p7 = scmp.lt.s32.totalorder %s1065_s27, 3 }
   0xd   : > { %p1153_p6 = por %p200_p3, %p44_p0  ;;  %s1067_s10 = smov [#allocation5]  }
   0xe   : > { %s1328_s30 = scalar_select %p1148_p4, 1, 0 }
   0xf   : > { %s1329_s8 = scalar_select %p1153_p6, 1, 0 }
  0x10   : > { %p1158_p8 = pnand %p772_p5, %p207_p7  ;;  %s219_s11 = sshll.u32 %s1067_s10, 4  ;;  %s220_s11 = int_to_ptr.vmem [resolvable:$true] %s219_s11 }
  0x11   : > { %s1068_s13 = smov [#allocation7]   ;;  %s928_s15 = scalar_lea.vmem %s220_s11, 256 }
  0x12   : > { %s1330_s9 = scalar_select %p1158_p8, 1, 0 }
  0x13   : > { %p831_p9 = pneg %p1158_p8  ;;  %s241_s14 = sshll.u32 %s1068_s13, 4  ;;  %s242_s14 = int_to_ptr.vmem [resolvable:$true] %s241_s14 }
  0x14   : > { %p929_p13 = scmp.ne.s32.totalorder %s220_s11, %s928_s15  ;;  %p936_p5 = scmp.lt.s32.totalorder %s220_s11, %s220_s11 }
  0x15   : > { %p1167_p11 = pnand %p831_p9, %p1322_p1  ;;  %p937_p7 = scmp.lt.s32.totalorder %s928_s15, %s928_s15 }
  0x17   : > { %p919_p12 = pneg %p1167_p11  ;;  %p938_p10 = por %p937_p7, %p936_p5 }
  0x19   : > { %p931_p0 = pnand %p929_p13, %p919_p12 }
  0x1b   : > { %p932_p3 = pneg %p931_p0 }
  0x1d   : > { %p939_p9 = pnand %p938_p10, %p932_p3 }
  0x1f   : > { %942 = shalt.err (!%p939_p9)
}
  0x20   : > { %s1069_s16 = smov 64   ;;  %s1070_s17 = smov 4  }
  0x21   : > { %s1332_s1 = sld [smem:[#allocation12_spill]]  ;;  %s954_s20 = scalar_lea.vmem %s242_s14, 1536 }
  0x22   : > { %p955_p1 = scmp.ne.s32.totalorder %s242_s14, %s954_s20  ;;  %p962_p2 = scmp.lt.s32.totalorder %s242_s14, %s242_s14 }
  0x23   : > { %p963_p6 = scmp.lt.s32.totalorder %s954_s20, %s954_s20 }
  0x24   : > { %p957_p13 = pnand %p955_p1, %p919_p12 }
  0x25   : > { %p964_p5 = por %p963_p6, %p962_p2 }
  0x26   : > { %p958_p0 = pneg %p957_p13 }
  0x27   : > { %834 = dma.hbm_to_vmem [thread:$0]  (!%p1167_p11), %s1332_s1, 256, %s220_s11, [#allocation6], %s1069_s16, %s1069_s16, %s1070_s17  }
  0x28   : > { %p965_p10 = pnand %p964_p5, %p958_p0 }
  0x2a   : > { %968 = shalt.err (!%p965_p10)
}
  0x2b   : > { %s1071_s21 = smov 384   ;;  %s1072_s22 = smov 24  }
  0x2c   : > { %s1333_s5 = sld [smem:[#allocation13_spill]]  ;;  %s1190_s10 = sadd.s32 1, %s1065_s27  }
  0x2d   : > { %s28_s11 = ssub.s32 %s1065_s27, %s1190_s10  ;;  %s31_s13 = sadd.s32 1, %s1061_s26 }
  0x2e   : > { %p29_p1 = scmp.eq.s32.totalorder %s28_s11, 0  ;;  %p38_p2 = scmp.ne.s32.totalorder %s1061_s26, %s1057_s25 }
  0x2f   : > { %p39_p6 = scmp.eq.s32.totalorder %s1065_s27, 0  ;;  %p1334_p3 = scmp.eq.s32.totalorder %s1139_s28, 1 }
  0x30   : > { %s1199_s15 = scalar_select %p29_p1, %s1061_s26, %s31_s13  }
  0x31   : > { %p40_p12 = por %p39_p6, %p38_p2  ;;  %p1203_p7 = por %p1334_p3, %p38_p2 }
  0x32   : > { %837 = dma.hbm_to_vmem [thread:$0]  (!%p1167_p11), %s1333_s5, 1536, %s242_s14, [#allocation6], %s1071_s21, %s1071_s21, %s1072_s22  }
  0x33   : > { %s1335_s16 = scalar_select %p1203_p7, 1, 0 }
  0x34   : > { %p848_p9 = scmp.lt.s32.totalorder %s1065_s27, 2  ;;  %s258_s12 = sand.u32 1, %s1061_s26  }
  0x35   : > { %s776_s17 = sshll.u32 %s258_s12, 2  ;;  %s777_s14 = sshll.u32 %s1065_s27, 6 }
  0x36   : > { %s1213_s20 = scalar_lea.hbm %s1314_s0, %s777_s14  ;;  %s262_s21 = scalar_lea.vmem [#allocation2], %s776_s17 }
  0x37   : > { %s269_s22 = sshll.u32 %s262_s21, 4  ;;  %p1215_p11 = pnand %p848_p9, %p40_p12  ;;  %s270_s22 = int_to_ptr.vmem [resolvable:$true] %s269_s22 }
  0x38   : > { %s259_s29 = scalar_lea.sflag [#allocation3], %s258_s12  ;;  %s969_s11 = scalar_lea.hbm %s1213_s20, 64 }
  0x39   : > { %p970_p13 = scmp.ne.s32.totalorder %s1213_s20, %s969_s11  ;;  %p971_p0 = pneg %p1215_p11 }
  0x3a   : > { %s974_s18 = scalar_lea.hbm %s1314_s0, 128  ;;  %p975_p1 = scmp.lt.s32.totalorder %s1213_s20, %s1314_s0 }
  0x3b   : > { %p972_p5 = pnand %p971_p0, %p970_p13  ;;  %p976_p2 = scmp.lt.s32.totalorder %s974_s18, %s969_s11 }
  0x3d   : > { %p973_p10 = pneg %p972_p5  ;;  %p977_p6 = por %p976_p2, %p975_p1 }
  0x3f   : > { %p978_p12 = pnand %p977_p6, %p973_p10 }
  0x41   : > { %981 = shalt.err (!%p978_p12)
}
  0x42   : > { %s982_s21 = scalar_lea.vmem %s270_s22, 64  ;;  %s1073_s12 = smov [#allocation2]  }
  0x43   : > { %p983_p3 = scmp.ne.s32.totalorder %s270_s22, %s982_s21  ;;  %s987_s1 = sshll.u32 %s1073_s12, 4  ;;  %s988_s1 = int_to_ptr.vmem [resolvable:$false] %s987_s1 }
  0x44   : > { %s989_s5 = scalar_lea.vmem %s988_s1, 128  ;;  %p990_p13 = scmp.lt.s32.totalorder %s270_s22, %s988_s1 }
  0x45   : > { %p985_p9 = pnand %p983_p3, %p971_p0  ;;  %p991_p5 = scmp.lt.s32.totalorder %s989_s5, %s982_s21 }
  0x47   : > { %p986_p7 = pneg %p985_p9  ;;  %p992_p4 = por %p991_p5, %p990_p13 }
  0x49   : > { %p993_p8 = pnand %p992_p4, %p986_p7 }
  0x4b   : > { %996 = shalt.err (!%p993_p8)
}
  0x4c   : > { %841 = dma.hbm_to_vmem [thread:$0]  (!%p1215_p11), %s1213_s20, 64, %s270_s22, %s259_s29  }
  0x4d   : > { %p1337_p10 = scmp.ne.s32.totalorder %s1330_s9, 0 }
  0x4e   : > { %s1236_s11 = sand.u32 (!%p1337_p10), 1, %s1057_s25   ;;  %p1338_p0 = scmp.ne.s32.totalorder (!%p1337_p10), %s1328_s30, 0 }
  0x4f   : > { %278 = sbr.rel (%p1337_p10) target bundleno = 704 (0x2c0), region = 48  ;;  %s779_s13 = sshll.u32 (!%p1337_p10), %s1236_s11, 2 }
  0x50   : > { %s281_s14 = scalar_lea.sflag (!%p1337_p10), [#allocation3], %s1236_s11  ;;  %s284_s1 = scalar_lea.vmem (!%p1337_p10), [#allocation2], %s779_s13 }
  0x54   : > { %1040 = dma.done.wait (%p1338_p0), %s281_s14, 64  }
  0x55   : > { %1042 = vsyncadd (%p1338_p0), %s281_s14, 4294967232  ;;  %p1339_p4 = scmp.eq.s32.totalorder %s1139_s28, 0 }
  0x57   : > { %1044 = dma.done.wait (%p1339_p4), [#allocation6], 1792   ;;  %p1340_p8 = pmov %p1339_p4 }
  0x58   : > { %v1074_v0 = vmov 0.0   ;;  %vm1075_vm0 = vmmov 0   ;;  %v893_v1 = vld [vmem:[#allocation5 + $0x8] sm:$0xff]   ;;  %v894_v2 = vld [vmem:[#allocation5] sm:$0xff]   ;;  %v324_v3 = vld [vmem:[%s284_s1] sm:$0xf]  ;;  %v445_v47 = vlaneseq }
  0x59   : > { %1046 = vsyncadd (%p1340_p8), [#allocation6], 4294965504  ;;  %809 = vmatprep.subr.bf16.mxu0 %v1074_v0  ;;  %813 = vmatprep.mubr.msk.bf16.mxu0 %vm1075_vm0, %v1074_v0  ;;  %vm348_vm1 = vcmask 261120   ;;  %v782_v4 = vld [vmem:[%s1316_s2] ss:$0 sm:$0xff]  ;;  %v1076_v27 = vmov 0  }
  0x5a   : > { %810 = vmatpush3.bf16.msra.mxu0 %v893_v1  ;;  %v895_v18 = vld [vmem:[#allocation7 + $0x34] ss:$24 sps:$4 sm:$0xff]   ;;  %v897_v19 = vld [vmem:[#allocation7 + $0x30] ss:$24 sps:$4 sm:$0xff]   ;;  %v901_v22 = vld [vmem:[#allocation7 + $0x4] ss:$24 sps:$4 sm:$0xff]   ;;  %570 = vmatprep.mubr.bf16.mxu1 %v1076_v27 }
  0x5b   : > { %811 = vmatprep.subr.bf16.mxu0 %v1074_v0  ;;  %v898_v20 = vld [vmem:[#allocation7 + $0x38] ss:$24 sps:$4 sm:$0xff]   ;;  %v900_v21 = vld [vmem:[#allocation7 + $0x3c] ss:$24 sps:$4 sm:$0xff]   ;;  %550 = vmatprep.subr.bf16.mxu1 %v895_v18  ;;  %v906_v23 = vld [vmem:[#allocation7 + $0xc] ss:$24 sps:$4 sm:$0xff]  }
  0x5c   : > { %551 = vmatpush1.bf16.msra.mxu1 %v897_v19  ;;  %v903_v24 = vld [vmem:[#allocation7] ss:$24 sps:$4 sm:$0xff]   ;;  %v909_v26 = vld [vmem:[#allocation7 + $0x44] ss:$24 sps:$4 sm:$0xff]   ;;  %v786_v38 = vld [vmem:[%s1317_s3] ss:$0 sm:$0xff] }
  0x5d   : > { %552 = vmatprep.subr.bf16.mxu1 %v901_v22  ;;  %v904_v25 = vld [vmem:[#allocation7 + $0x8] ss:$24 sps:$4 sm:$0xff]   ;;  %v912_v45 = vld [vmem:[#allocation7 + $0x14] ss:$24 sps:$4 sm:$0xff]   ;;  %v446_v48 = vshrl.u32 %v445_v47, 7  ;;  %s817_s19 = smul.u32 48, %s1236_s11 }
  0x5e   : > { %812 = vmatpush3.bf16.msra.mxu0 %v894_v2  ;;  %v787_v40 = vld [vmem:[%s1318_s4] ss:$0 sm:$0xff]  ;;  %v907_v43 = vld [vmem:[#allocation7 + $0x40] ss:$24 sps:$4 sm:$0xff]   ;;  %s818_s21 = smul.u32 768, %s1139_s28  ;;  %s668_s28 = scalar_lea.sflag [#allocation4], %s1236_s11 }
  0x5f   : > { %591 = vmatprep.subr.bf16.mxu0 %v900_v21  ;;  %v910_v46 = vld [vmem:[#allocation7 + $0x10] ss:$24 sps:$4 sm:$0xff]   ;;  %v447_v49 = vsub.s32 0, %v446_v48  ;;  %v455_v50 = vsub.s32 2, %v446_v48  ;;  %v451_v52 = vsub.s32 1, %v446_v48  ;;  %v459_v53 = vsub.s32 3, %v446_v48 }
  0x60   : > { %553 = vmatpush1.bf16.msra.mxu1 %v903_v24  ;;  %v443_v51 = vld [vmem:[%s1320_s6] sm:$0x3f]  ;;  %v463_v62 = vsub.s32 4, %v446_v48  ;;  %s322_s17 = scalar_lea.vmem [#allocation8], %s817_s19  ;;  %s1271_s1 = scalar_lea.hbm %s1321_s7, %s818_s21 }
  0x61   : > { %814 = vmatmul.mubr.msk.bf16.vlgmr.msra.gmra.mxu0 %vm348_vm1, %v324_v3  ;;  %632 = vmatprep.subr.bf16.mxu1 %v909_v26  ;;  %v448_v54 = vrot.slane %v443_v51, %v447_v49  ;;  %v456_v55 = vrot.slane %v443_v51, %v455_v50  ;;  %v452_v56 = vrot.slane %v443_v51, %v451_v52  ;;  %v467_v3 = vsub.s32 5, %v446_v48  ;;  %s682_s12 = sshll.u32 %s322_s17, 4  ;;  %p1341_p11 = scmp.ne.s32.totalorder %s1335_s16, 0  ;;  %s1273_s12 = int_to_ptr.vmem [resolvable:$true] %s682_s12 }
  0x62   : > { %592 = vmatpush1.bf16.msra.mxu0 %v898_v20  ;;  %611 = vmatprep.mubr.bf16.mxu0 %v1076_v27  ;;  %v460_v57 = vrot.slane %v443_v51, %v459_v53  ;;  %s997_s5 = scalar_lea.vmem %s1273_s12, 768  ;;  %s1077_s30 = smov [#allocation8]  }
  0x63   : > { %593 = vmatprep.subr.bf16.mxu0 %v906_v23  ;;  %p998_p7 = scmp.ne.s32.totalorder %s1273_s12, %s997_s5  ;;  %s1001_s9 = sshll.u32 %s1077_s30, 4  ;;  %s1002_s9 = int_to_ptr.vmem [resolvable:$false] %s1001_s9 }
  0x64   : > { %s1003_s20 = scalar_lea.vmem %s1002_s9, 1536  ;;  %p1004_p6 = scmp.lt.s32.totalorder %s1273_s12, %s1002_s9 }
  0x65   : > { %p999_p1 = pnand %p998_p7, %p1341_p11  ;;  %p1005_p12 = scmp.lt.s32.totalorder %s1003_s20, %s997_s5 }
  0x66   : > { %594 = vmatpush1.bf16.msra.mxu0 %v904_v25 }
  0x67   : > { %p1000_p2 = pneg %p999_p1  ;;  %p1006_p3 = por %p1005_p12, %p1004_p6 }
  0x69   : > { %p1007_p9 = pnand %p1006_p3, %p1000_p2 }
 0x121   : > { %v386_v5 = vpop.f32.mrf.mxu0 }
 0x122   : > { %v387_v6 = vadd.f32 %v782_v4, %v386_v5 }
 0x123   : > { %v815_v7 = vpop.f32.mrf.mxu0 }
 0x124   : > { %v394_v8 = vmul.f32 0.70710677, %v387_v6  ;;  %v392_v12 = vmul.f32 0.5, %v387_v6  ;;  %v464_v6 = vrot.slane %v443_v51, %v463_v62 }
 0x125   : > { %v389_v9 = vpop.f32.mrf.mxu0 }
 0x126   : > { %913 = verf.f32 %v394_v8  ;;  %v468_v9 = vrot.slane %v443_v51, %v467_v3 }
 0x127   : > { %v816_v10 = vpop.f32.mrf.mxu0 }
 0x133   : > { %v914_v11 = vpop.eup %913 }
 0x134   : > { %v396_v13 = vadd.f32 1.0, %v914_v11 }
 0x136   : > { %v397_v14 = vmul.f32 %v396_v13, %v392_v12 }
 0x138   : > { %v398_v15 = vsel %vm348_vm1, %v397_v14, 0.0  ;;  %v401_v16 = vmul.f32 %v397_v14, %v397_v14 }
 0x139   : > { %399 = vadd.xlane.f32.xlu0 %v398_v15 }
 0x13a   : > { %v402_v17 = vsel %vm348_vm1, %v401_v16, 0.0 }
 0x13d   : > { %403 = vadd.xlane.f32.xlu0 %v402_v17 }
 0x1c2   : > { %v400_v28 = vpop.xlane.xlu0 %399 }
 0x1c3   : > { %v405_v29 = vmul.f32 0.03125, %v400_v28 }
 0x1c5   : > { %v407_v31 = vmul.f32 %v405_v29, %v405_v29  ;;  %v410_v36 = vsub.f32 %v397_v14, %v405_v29 }
 0x1c6   : > { %v404_v30 = vpop.xlane.xlu0 %403 }
 0x1c7   : > { %v406_v32 = vmul.f32 0.03125, %v404_v30 }
 0x1c9   : > { %v408_v33 = vsub.f32 %v406_v32, %v407_v31 }
 0x1cb   : > { %v409_v34 = vmax.f32 %v408_v33, 0.0 }
 0x1cd   : > { %v411_v35 = vadd.f32 1e-12, %v409_v34 }
 0x1cf   : > { %915 = vrsqrt.f32 %v411_v35 }
 0x1dc   : > { %v916_v37 = vpop.eup %915 }
 0x1dd   : > { %v413_v39 = vmul.f32 %v916_v37, %v410_v36 }
 0x1df   : > { %v421_v41 = vmul.f32 %v786_v38, %v413_v39 }
 0x1e1   : > { %v429_v42 = vadd.f32 %v787_v40, %v421_v41 }
 0x1e3   : > { %v430_v44 = vpack.c.bf16 %v429_v42, %v429_v42 }
 0x1e5   : > { %800 = vmatmul.mubr.msk.bf16.vlgmr.msra.gmra.mxu1 %vm348_vm1, %v430_v44  ;;  %801 = vmatmul.mubr.msk.bf16.vlgmr.msra.gmra.mxu0 %vm348_vm1, %v430_v44 }
 0x1e6   : > { %633 = vmatpush1.bf16.msra.mxu1 %v907_v43  ;;  %652 = vmatprep.mubr.bf16.mxu1 %v1076_v27 }
 0x1e7   : > { %634 = vmatprep.subr.bf16.mxu1 %v912_v45 }
 0x1ea   : > { %635 = vmatpush1.bf16.msra.mxu1 %v910_v46 }
 0x1ed   : > { %802 = vmatmul.mubr.msk.bf16.vlgmr.msra.gmra.mxu1 %vm348_vm1, %v430_v44 }
 0x2a5   : > { %v572_v58 = vpop.f32.mrf.mxu1  ;;  %v613_v59 = vpop.f32.mrf.mxu0 }
 0x2a6   : > { %v573_v60 = vadd.f32 %v572_v58, %v448_v54  ;;  %v614_v61 = vadd.f32 %v613_v59, %v456_v55 }
 0x2a7   : > { %v574_v63 = vpop.f32.mrf.mxu1  ;;  %v615_v0 = vpop.f32.mrf.mxu0 }
 0x2a8   : > { %661 = vst [vmem:[%s322_s17] sm:$0xff] %v573_v60  ;;  %663 = vst [vmem:[%s322_s17 + $0x10] sm:$0xff] %v614_v61  ;;  %v575_v1 = vadd.f32 %v574_v63, %v452_v56  ;;  %v616_v2 = vadd.f32 %v615_v0, %v460_v57 }
 0x2a9   : > { %v576_v4 = vpop.f32.mrf.mxu1  ;;  %v617_v5 = vpop.f32.mrf.mxu0 }
 0x2aa   : > { %662 = vst [vmem:[%s322_s17 + $0x8] sm:$0xff] %v575_v1  ;;  %664 = vst [vmem:[%s322_s17 + $0x18] sm:$0xff] %v616_v2 }
 0x2ab   : > { %v577_v7 = vpop.f32.mrf.mxu1  ;;  %v618_v8 = vpop.f32.mrf.mxu0 }
 0x2ad   : > { %v654_v10 = vpop.f32.mrf.mxu1 }
 0x2ae   : > { %v655_v11 = vadd.f32 %v654_v10, %v464_v6 }
 0x2af   : > { %v656_v12 = vpop.f32.mrf.mxu1 }
 0x2b0   : > { %665 = vst [vmem:[%s322_s17 + $0x20] sm:$0xff] %v655_v11  ;;  %v657_v13 = vadd.f32 %v656_v12, %v468_v9 }
 0x2b1   : > { %v658_v14 = vpop.f32.mrf.mxu1 }
 0x2b2   : > { %666 = vst [vmem:[%s322_s17 + $0x28] sm:$0xff] %v657_v13 }
 0x2b3   : > { %v659_v15 = vpop.f32.mrf.mxu1 }
 0x2b4   : > { %1010 = shalt.err (!%p1007_p9)
}
 0x2b5   : > { %s1011_s22 = scalar_lea.hbm %s1271_s1, 768  ;;  %s1015_s29 = scalar_lea.hbm %s1321_s7, 1536 }
 0x2b6   : > { %p1012_p13 = scmp.ne.s32.totalorder %s1271_s1, %s1011_s22  ;;  %p1016_p0 = scmp.lt.s32.totalorder %s1271_s1, %s1321_s7 }
 0x2b7   : > { %p1017_p4 = scmp.lt.s32.totalorder %s1015_s29, %s1011_s22 }
 0x2b8   : > { %p1013_p5 = pnand %p1012_p13, %p1341_p11 }
 0x2b9   : > { %p1018_p8 = por %p1017_p4, %p1016_p0 }
 0x2ba   : > { %p1014_p10 = pneg %p1013_p5 }
 0x2bc   : > { %p1019_p7 = pnand %p1018_p8, %p1014_p10 }
 0x2be   : > { %1022 = shalt.err (!%p1019_p7)
}
 0x2bf   : > { %829 = dma.vmem_to_hbm [thread:$0]  (%p1341_p11), %s1273_s12, 768, %s1271_s1, %s668_s28  }
 0x2c0 PF: > { %s694_s17 = sand.u32 1, %s1053_s24   ;;  %p1342_p1 = scmp.ne.s32.totalorder %s1329_s8, 0 }
 0x2c1   : > { %p1343_p2 = scmp.ge.s32.totalorder %s1065_s27, 2  ;;  %s695_s21 = scalar_lea.sflag [#allocation4], %s694_s17 }
 0x2c3   : > { %p843_p6 = pnand %p1343_p2, %p1342_p1 }
 0x2c5   : > { %p844_p12 = pneg %p843_p6 }
 0x2c7   : > { %1048 = dma.done.wait (%p844_p12), %s695_s21, 768  }
 0x2c8   : > { %1050 = vsyncadd (%p844_p12), %s695_s21, 4294966528  ;;  %p21_p3 = scmp.ge.s32.totalorder %s1190_s10, 4   ;;  %s1344_s24 = smov %s1057_s25 }
 0x2c9   : > { %s1345_s25 = smov %s1061_s26  ;;  %s1346_s26 = smov %s1199_s15 }
 0x2ca   : > { %s1347_s27 = smov %s1190_s10  ;;  %23 = sbr.rel (!%p21_p3) target bundleno = 9 (0x9), region = 101 }
 0x2cf   :  { %700 = vsyncpa [#allocation3], 1 }
 0x2d0   :  { %702 = vsyncpa [#allocation3 + $0x1], 1 }
 0x2d1   :  { %703 = vsyncpa [#allocation6], 1 }
 0x2d2   :  { %704 = vsyncpa [#allocation4], 1 }
 0x2d3   :  { %706 = vsyncpa [#allocation4 + $0x1], 1 }

</bundles_post_ra>
